<compile_context>
chip_gen: v7x
topology: tpu7x:2x2x1
jax: 0.10.0
libtpu: 0.0.40
codegen_flags: <defaults>
</compile_context>

<pallas_src>
import functools

import jax
import jax.numpy as jnp
from jax.experimental import pallas as pl
from jax.experimental.pallas import tpu as pltpu


def _round_up(v, m):
    return ((v + m - 1) // m) * m


def _cdiv(a, b):
    return -(-a // b)


def _mlp_kernel(n_layers, *refs):
    """Fused MLP over one batch tile.

    refs = (x_ref, w0, b0, w1, b1, ..., wL, bL, out_ref) where layers
    0..n_layers-1 are hidden (Linear + Tanh) and layer n_layers is the final
    Linear.  Matmul operands are bf16 (MXU-native), accumulation / bias-add /
    tanh stay in f32 (v5e VPU/EUP has no bf16).
    """
    x_ref = refs[0]
    out_ref = refs[-1]
    param_refs = refs[1:-1]

    # Input may arrive as f32 (aligned fast path) or bf16 (padded path);
    # cast to the MXU-native dtype in-kernel (free if already bf16).
    h = x_ref[...].astype(jnp.bfloat16)          # (TB, d_in_pad)
    for li in range(n_layers + 1):
        w = param_refs[2 * li][...]              # bf16 (in_pad, out_pad)
        b = param_refs[2 * li + 1][...]          # f32  (1, out_pad)
        acc = jnp.dot(h, w, preferred_element_type=jnp.float32) + b
        if li < n_layers:
            # Dropout(0.0) / no BatchNorm -> identities.
            h = jnp.tanh(acc).astype(jnp.bfloat16)
        else:
            h = acc
    out_ref[...] = h                             # f32 (TB, d_out_pad)


def _forward(x, params, n_layers, batch_tile, single_buffer_weights):
    B = x.shape[0]
    x2d = x.reshape(B, -1)
    d_in = x2d.shape[1]
    d_out = params[-1][0].shape[1]

    # ---- lane-dense padding of every feature dim to a multiple of 128 ----
    d_in_pad = _round_up(d_in, 128)
    padded = []
    prev_pad = d_in_pad
    for (w, b) in params:
        fin, fout = w.shape
        fout_pad = _round_up(fout, 128)
        w_p = jnp.zeros((prev_pad, fout_pad), jnp.bfloat16)
        w_p = w_p.at[:fin, :fout].set(w.astype(jnp.bfloat16))
        b_p = jnp.zeros((1, fout_pad), jnp.float32)
        b_p = b_p.at[0, :fout].set(b.astype(jnp.float32))
        padded.append((w_p, b_p))
        prev_pad = fout_pad
    d_out_pad = prev_pad

    feat_aligned = (d_in == d_in_pad)
    in_elem_bytes = 4 if feat_aligned else 2     # f32 straight-through vs bf16 pad

    # ---- per-generation VMEM budget ----
    try:
        vmem_cap = int(pltpu.get_tpu_info().vmem_capacity_bytes)
    except Exception:
        vmem_cap = 64 << 20                      # conservative (v7x per-TC) fallback
    budget = int(vmem_cap * 0.85)

    wb_bytes = sum(w.size * 2 + b.size * 4 for (w, b) in padded)
    wb_resident = wb_bytes * (1 if single_buffer_weights else 2)

    max_width = max([d_in_pad, d_out_pad] + [w.shape[1] for (w, _) in padded])
    per_row = (2 * d_in_pad * in_elem_bytes      # double-buffered input tile
               + 2 * d_out_pad * 4               # double-buffered output tile
               + 4 * max_width * 4)              # f32 intermediates / spill estimate

    # ---- batch tiling: TB from the VMEM budget, MXU/vreg-friendly packing ----
    pack = 256 if B >= 256 else 16               # [16,128] bf16 vregs; 256-wide MXU slabs
    avail = budget - wb_resident - (4 << 20)     # margin for mosaic internal scratch
    tb_max = max(pack, min(2048, avail // per_row))
    if batch_tile is not None:
        tb_max = max(pack, batch_tile)
    tb_max = max(pack, (tb_max // pack) * pack)

    n_tiles_min = 2 if B >= 2 * pack else 1      # keep both v7x TensorCores busy
    n_tiles_target = max(_cdiv(B, tb_max), n_tiles_min)
    TB = _round_up(_cdiv(B, n_tiles_target), pack)   # last tile nearly full
    B_pad = _round_up(max(B, TB), TB)
    n_tiles = B_pad // TB

    # ---- input prep: skip the wrapper pad/cast pass when possible ----
    if feat_aligned and B == B_pad:
        x_in = x2d.astype(jnp.float32)           # fed straight; bf16 cast in-kernel
    elif feat_aligned:
        x_in = jnp.pad(x2d.astype(jnp.float32), ((0, B_pad - B), (0, 0)))
    else:
        # Explicit zero-pad (never feed OOB garbage into tanh via the matmul).
        x_in = jnp.pad(x2d.astype(jnp.bfloat16),
                       ((0, B_pad - B), (0, d_in_pad - d_in)))

    # ---- specs ----
    flat_inputs = [x_in]
    in_specs = [pl.BlockSpec((TB, d_in_pad), lambda i: (i, 0))]

    def _resident_spec(shape):
        # Constant block index -> stays VMEM-resident across the whole grid.
        if single_buffer_weights:
            return pl.BlockSpec(shape, lambda i: (0, 0),
                                pipeline_mode=pl.Buffered(1))
        return pl.BlockSpec(shape, lambda i: (0, 0))

    for (w_p, b_p) in padded:
        flat_inputs.append(w_p)
        flat_inputs.append(b_p)
        in_specs.append(_resident_spec(w_p.shape))
        in_specs.append(_resident_spec(b_p.shape))

    out_shape = jax.ShapeDtypeStruct((B_pad, d_out_pad), jnp.float32)
    out_spec = pl.BlockSpec((TB, d_out_pad), lambda i: (i, 0))

    # ---- VMEM limit sized from the real working set, per-generation cap ----
    needed = wb_resident + TB * per_row + (8 << 20)
    vmem_bytes = int(min(vmem_cap, max(needed, 16 << 20)))

    # ---- advisory cost estimate ----
    flops = 2 * B_pad * sum(w.shape[0] * w.shape[1] for (w, _) in padded)
    transcendentals = B_pad * sum(w.shape[1] for (w, _) in padded[:n_layers])
    bytes_accessed = (x_in.size * in_elem_bytes
                      + B_pad * d_out_pad * 4 + wb_bytes)
    cost = pl.CostEstimate(flops=flops,
                           transcendentals=transcendentals,
                           bytes_accessed=bytes_accessed)

    kernel = functools.partial(_mlp_kernel, n_layers)

    out = pl.pallas_call(
        kernel,
        out_shape=out_shape,
        grid=(n_tiles,),
        in_specs=in_specs,
        out_specs=out_spec,
        compiler_params=pltpu.CompilerParams(
            dimension_semantics=("parallel",),
            vmem_limit_bytes=vmem_bytes,
        ),
        cost_estimate=cost,
    )(*flat_inputs)

    # NOTE: consumers that accept the padded (B_pad, d_out_pad) slab can skip
    # this slice and save one HBM pass; kept here for a clean (B, d_out) API.
    return out[:B, :d_out]


def stacked_vector_model(x, params, *, n_layers, batch_tile=None):
    """x: (B, ...) flattened to (B, d_input); params: list of (W, b) with
    W shaped (in_features, out_features) (pre-transposed vs. PyTorch)."""
    try:
        return _forward(x, params, n_layers, batch_tile,
                        single_buffer_weights=True)
    except Exception:
        # pl.Buffered(1) (single-buffered resident weights) not supported by
        # this JAX build -> fall back to default double buffering.
        return _forward(x, params, n_layers, batch_tile,
                        single_buffer_weights=False)


def init_params(key, d_input, hidden_units, d_output, n_layers):
    """Deterministic init mimicking nn.Linear (uniform +-1/sqrt(fan_in)).
    Weights are stored as (in_features, out_features)."""
    params = []
    in_features = d_input
    dims = []
    for i in range(n_layers):
        out_features = hidden_units[i] if i < len(hidden_units) else hidden_units[-1]
        dims.append((in_features, out_features))
        in_features = out_features
    dims.append((in_features, d_output))

    for (fin, fout) in dims:
        key, kw, kb = jax.random.split(key, 3)
        bound = 1.0 / jnp.sqrt(jnp.float32(fin))
        w = jax.random.uniform(kw, (fin, fout), jnp.float32, -bound, bound)
        b = jax.random.uniform(kb, (fout,), jnp.float32, -bound, bound)
        params.append((w, b))
    return params


def reference_forward(x, params, n_layers):
    """Reference matching the kernel's bf16-matmul / f32-accumulate path.
    (Parity with the pure-f32 PyTorch model is ~1e-2 due to bf16 operands.)"""
    B = x.shape[0]
    h = x.reshape(B, -1).astype(jnp.float32)
    for li, (w, b) in enumerate(params):
        h = jnp.dot(h.astype(jnp.bfloat16), w.astype(jnp.bfloat16),
                    preferred_element_type=jnp.float32) + b.astype(jnp.float32)
        if li < n_layers:
            h = jnp.tanh(h)
    return h


if __name__ == "__main__":
    # Small shapes consistent with the module: input (2, 4, 16) -> d_input=64.
    n_layers = 2
    d_input = 4 * 16
    hidden_units = (32, 32)
    d_output = 8

    key = jax.random.PRNGKey(0)
    kx, kp = jax.random.split(key)
    x = jax.random.normal(kx, (2, 4, 16), dtype=jnp.float32)
    params = init_params(kp, d_input, hidden_units, d_output, n_layers)

    out = stacked_vector_model(x, params, n_layers=n_layers)
    out = jax.block_until_ready(out)

    ref = reference_forward(x, params, n_layers)
    assert out.shape == (2, d_output), out.shape
    err = float(jnp.max(jnp.abs(out - ref)))
    assert jnp.allclose(out, ref, atol=1e-4, rtol=1e-4), err
    print("KERNEL_OK")
</pallas_src>

<mosaic_0001>
module attributes {stable_mosaic.version = 11 : i64} {
  func.func @_mlp_kernel(%arg0: i32, %arg1: memref<16x128xbf16, #tpu.memory_space<vmem>>, %arg2: memref<128x128xbf16, #tpu.memory_space<vmem>>, %arg3: memref<1x128xf32, #tpu.memory_space<vmem>>, %arg4: memref<128x128xbf16, #tpu.memory_space<vmem>>, %arg5: memref<1x128xf32, #tpu.memory_space<vmem>>, %arg6: memref<128x128xbf16, #tpu.memory_space<vmem>>, %arg7: memref<1x128xf32, #tpu.memory_space<vmem>>, %arg8: memref<16x128xf32, #tpu.memory_space<vmem>>) attributes {dimension_semantics = [#tpu.dimension_semantics<parallel>], iteration_bounds = array<i64: 1>, scalar_prefetch = 0 : i64, scratch_operands = 0 : i64, tpu.core_type = #tpu.core_type<tc>, window_params = [{transform_indices = @transform_0, window_bounds = array<i64: 16, 128>}, {pipeline_mode = #tpu.pipeline_mode<synchronous>, transform_indices = @transform_1, window_bounds = array<i64: 128, 128>}, {pipeline_mode = #tpu.pipeline_mode<synchronous>, transform_indices = @transform_2, window_bounds = array<i64: 1, 128>}, {pipeline_mode = #tpu.pipeline_mode<synchronous>, transform_indices = @transform_3, window_bounds = array<i64: 128, 128>}, {pipeline_mode = #tpu.pipeline_mode<synchronous>, transform_indices = @transform_4, window_bounds = array<i64: 1, 128>}, {pipeline_mode = #tpu.pipeline_mode<synchronous>, transform_indices = @transform_5, window_bounds = array<i64: 128, 128>}, {pipeline_mode = #tpu.pipeline_mode<synchronous>, transform_indices = @transform_6, window_bounds = array<i64: 1, 128>}, {transform_indices = @transform_7, window_bounds = array<i64: 16, 128>}]} {
    %c0 = arith.constant 0 : index
    %c0_0 = arith.constant 0 : index
    %0 = vector.load %arg1[%c0, %c0_0] : memref<16x128xbf16, #tpu.memory_space<vmem>>, vector<16x128xbf16>
    %c0_1 = arith.constant 0 : index
    %c0_2 = arith.constant 0 : index
    %1 = vector.load %arg2[%c0_1, %c0_2] : memref<128x128xbf16, #tpu.memory_space<vmem>>, vector<128x128xbf16>
    %c0_3 = arith.constant 0 : index
    %c0_4 = arith.constant 0 : index
    %2 = vector.load %arg3[%c0_3, %c0_4] : memref<1x128xf32, #tpu.memory_space<vmem>>, vector<1x128xf32>
    %cst = arith.constant dense<0.000000e+00> : vector<16x128xf32>
    %3 = tpu.matmul %0, %1, %cst {dimension_numbers = #tpu.dot_dimension_numbers<[1], [0], [0], [1], [0, 0, 1, 1], [], []>} : vector<16x128xbf16>, vector<128x128xbf16>, vector<16x128xf32> -> vector<16x128xf32>
    %4 = vector.broadcast %2 : vector<1x128xf32> to vector<16x128xf32>
    %5 = arith.addf %3, %4 : vector<16x128xf32>
    %6 = math.tanh %5 : vector<16x128xf32>
    %7 = arith.truncf %6 : vector<16x128xf32> to vector<16x128xbf16>
    %c0_5 = arith.constant 0 : index
    %c0_6 = arith.constant 0 : index
    %8 = vector.load %arg4[%c0_5, %c0_6] : memref<128x128xbf16, #tpu.memory_space<vmem>>, vector<128x128xbf16>
    %c0_7 = arith.constant 0 : index
    %c0_8 = arith.constant 0 : index
    %9 = vector.load %arg5[%c0_7, %c0_8] : memref<1x128xf32, #tpu.memory_space<vmem>>, vector<1x128xf32>
    %cst_9 = arith.constant dense<0.000000e+00> : vector<16x128xf32>
    %10 = tpu.matmul %7, %8, %cst_9 {dimension_numbers = #tpu.dot_dimension_numbers<[1], [0], [0], [1], [0, 0, 1, 1], [], []>} : vector<16x128xbf16>, vector<128x128xbf16>, vector<16x128xf32> -> vector<16x128xf32>
    %11 = vector.broadcast %9 : vector<1x128xf32> to vector<16x128xf32>
    %12 = arith.addf %10, %11 : vector<16x128xf32>
    %13 = math.tanh %12 : vector<16x128xf32>
    %14 = arith.truncf %13 : vector<16x128xf32> to vector<16x128xbf16>
    %c0_10 = arith.constant 0 : index
    %c0_11 = arith.constant 0 : index
    %15 = vector.load %arg6[%c0_10, %c0_11] : memref<128x128xbf16, #tpu.memory_space<vmem>>, vector<128x128xbf16>
    %c0_12 = arith.constant 0 : index
    %c0_13 = arith.constant 0 : index
    %16 = vector.load %arg7[%c0_12, %c0_13] : memref<1x128xf32, #tpu.memory_space<vmem>>, vector<1x128xf32>
    %cst_14 = arith.constant dense<0.000000e+00> : vector<16x128xf32>
    %17 = tpu.matmul %14, %15, %cst_14 {dimension_numbers = #tpu.dot_dimension_numbers<[1], [0], [0], [1], [0, 0, 1, 1], [], []>} : vector<16x128xbf16>, vector<128x128xbf16>, vector<16x128xf32> -> vector<16x128xf32>
    %18 = vector.broadcast %16 : vector<1x128xf32> to vector<16x128xf32>
    %19 = arith.addf %17, %18 : vector<16x128xf32>
    %c0_15 = arith.constant 0 : index
    %c0_16 = arith.constant 0 : index
    %20 = vector.load %arg8[%c0_15, %c0_16] : memref<16x128xf32, #tpu.memory_space<vmem>>, vector<16x128xf32>
    tpu.vector_store %arg8[%c0_15, %c0_16], %19 {strides = array<i32>} : memref<16x128xf32, #tpu.memory_space<vmem>>, vector<16x128xf32>,
    return
  }
  func.func @transform_0(%arg0: i32) -> (i32, i32) {
    %c0_i32 = arith.constant 0 : i32
    %c0_i32_0 = arith.constant 0 : i32
    return %arg0, %c0_i32 : i32, i32
  }
  func.func @transform_1(%arg0: i32) -> (i32, i32) {
    %c0_i32 = arith.constant 0 : i32
    %c0_i32_0 = arith.constant 0 : i32
    %c0_i32_1 = arith.constant 0 : i32
    return %c0_i32, %c0_i32_0 : i32, i32
  }
  func.func @transform_2(%arg0: i32) -> (i32, i32) {
    %c0_i32 = arith.constant 0 : i32
    %c0_i32_0 = arith.constant 0 : i32
    %c0_i32_1 = arith.constant 0 : i32
    return %c0_i32, %c0_i32_0 : i32, i32
  }
  func.func @transform_3(%arg0: i32) -> (i32, i32) {
    %c0_i32 = arith.constant 0 : i32
    %c0_i32_0 = arith.constant 0 : i32
    %c0_i32_1 = arith.constant 0 : i32
    return %c0_i32, %c0_i32_0 : i32, i32
  }
  func.func @transform_4(%arg0: i32) -> (i32, i32) {
    %c0_i32 = arith.constant 0 : i32
    %c0_i32_0 = arith.constant 0 : i32
    %c0_i32_1 = arith.constant 0 : i32
    return %c0_i32, %c0_i32_0 : i32, i32
  }
  func.func @transform_5(%arg0: i32) -> (i32, i32) {
    %c0_i32 = arith.constant 0 : i32
    %c0_i32_0 = arith.constant 0 : i32
    %c0_i32_1 = arith.constant 0 : i32
    return %c0_i32, %c0_i32_0 : i32, i32
  }
  func.func @transform_6(%arg0: i32) -> (i32, i32) {
    %c0_i32 = arith.constant 0 : i32
    %c0_i32_0 = arith.constant 0 : i32
    %c0_i32_1 = arith.constant 0 : i32
    return %c0_i32, %c0_i32_0 : i32, i32
  }
  func.func @transform_7(%arg0: i32) -> (i32, i32) {
    %c0_i32 = arith.constant 0 : i32
    %c0_i32_0 = arith.constant 0 : i32
    return %arg0, %c0_i32 : i32, i32
  }
}

module attributes {stable_mosaic.version = 11 : i64} {
  func.func @_mlp_kernel(%arg0: i32, %arg1: memref<16x128xbf16, #tpu.memory_space<vmem>>, %arg2: memref<128x128xbf16, #tpu.memory_space<vmem>>, %arg3: memref<1x128xf32, #tpu.memory_space<vmem>>, %arg4: memref<128x128xbf16, #tpu.memory_space<vmem>>, %arg5: memref<1x128xf32, #tpu.memory_space<vmem>>, %arg6: memref<128x128xbf16, #tpu.memory_space<vmem>>, %arg7: memref<1x128xf32, #tpu.memory_space<vmem>>, %arg8: memref<16x128xf32, #tpu.memory_space<vmem>>) attributes {dimension_semantics = [#tpu.dimension_semantics<parallel>], iteration_bounds = array<i64: 1>, scalar_prefetch = 0 : i64, scratch_operands = 0 : i64, tpu.core_type = #tpu.core_type<tc>, window_params = [{transform_indices = @transform_0, window_bounds = array<i64: 16, 128>}, {pipeline_mode = #tpu.pipeline_mode<synchronous>, transform_indices = @transform_1, window_bounds = array<i64: 128, 128>}, {pipeline_mode = #tpu.pipeline_mode<synchronous>, transform_indices = @transform_2, window_bounds = array<i64: 1, 128>}, {pipeline_mode = #tpu.pipeline_mode<synchronous>, transform_indices = @transform_3, window_bounds = array<i64: 128, 128>}, {pipeline_mode = #tpu.pipeline_mode<synchronous>, transform_indices = @transform_4, window_bounds = array<i64: 1, 128>}, {pipeline_mode = #tpu.pipeline_mode<synchronous>, transform_indices = @transform_5, window_bounds = array<i64: 128, 128>}, {pipeline_mode = #tpu.pipeline_mode<synchronous>, transform_indices = @transform_6, window_bounds = array<i64: 1, 128>}, {transform_indices = @transform_7, window_bounds = array<i64: 16, 128>}]} {
    %c0 = arith.constant 0 : index
    %c0_0 = arith.constant 0 : index
    %0 = vector.load %arg1[%c0, %c0_0] : memref<16x128xbf16, #tpu.memory_space<vmem>>, vector<16x128xbf16>
    %c0_1 = arith.constant 0 : index
    %c0_2 = arith.constant 0 : index
    %1 = vector.load %arg2[%c0_1, %c0_2] : memref<128x128xbf16, #tpu.memory_space<vmem>>, vector<128x128xbf16>
    %c0_3 = arith.constant 0 : index
    %c0_4 = arith.constant 0 : index
    %2 = vector.load %arg3[%c0_3, %c0_4] : memref<1x128xf32, #tpu.memory_space<vmem>>, vector<1x128xf32>
    %cst = arith.constant dense<0.000000e+00> : vector<16x128xf32>
    %3 = tpu.matmul %0, %1, %cst {dimension_numbers = #tpu.dot_dimension_numbers<[1], [0], [0], [1], [0, 0, 1, 1], [], []>} : vector<16x128xbf16>, vector<128x128xbf16>, vector<16x128xf32> -> vector<16x128xf32>
    %4 = vector.broadcast %2 : vector<1x128xf32> to vector<16x128xf32>
    %5 = arith.addf %3, %4 : vector<16x128xf32>
    %6 = math.tanh %5 : vector<16x128xf32>
    %7 = arith.truncf %6 : vector<16x128xf32> to vector<16x128xbf16>
    %c0_5 = arith.constant 0 : index
    %c0_6 = arith.constant 0 : index
    %8 = vector.load %arg4[%c0_5, %c0_6] : memref<128x128xbf16, #tpu.memory_space<vmem>>, vector<128x128xbf16>
    %c0_7 = arith.constant 0 : index
    %c0_8 = arith.constant 0 : index
    %9 = vector.load %arg5[%c0_7, %c0_8] : memref<1x128xf32, #tpu.memory_space<vmem>>, vector<1x128xf32>
    %cst_9 = arith.constant dense<0.000000e+00> : vector<16x128xf32>
    %10 = tpu.matmul %7, %8, %cst_9 {dimension_numbers = #tpu.dot_dimension_numbers<[1], [0], [0], [1], [0, 0, 1, 1], [], []>} : vector<16x128xbf16>, vector<128x128xbf16>, vector<16x128xf32> -> vector<16x128xf32>
    %11 = vector.broadcast %9 : vector<1x128xf32> to vector<16x128xf32>
    %12 = arith.addf %10, %11 : vector<16x128xf32>
    %13 = math.tanh %12 : vector<16x128xf32>
    %14 = arith.truncf %13 : vector<16x128xf32> to vector<16x128xbf16>
    %c0_10 = arith.constant 0 : index
    %c0_11 = arith.constant 0 : index
    %15 = vector.load %arg6[%c0_10, %c0_11] : memref<128x128xbf16, #tpu.memory_space<vmem>>, vector<128x128xbf16>
    %c0_12 = arith.constant 0 : index
    %c0_13 = arith.constant 0 : index
    %16 = vector.load %arg7[%c0_12, %c0_13] : memref<1x128xf32, #tpu.memory_space<vmem>>, vector<1x128xf32>
    %cst_14 = arith.constant dense<0.000000e+00> : vector<16x128xf32>
    %17 = tpu.matmul %14, %15, %cst_14 {dimension_numbers = #tpu.dot_dimension_numbers<[1], [0], [0], [1], [0, 0, 1, 1], [], []>} : vector<16x128xbf16>, vector<128x128xbf16>, vector<16x128xf32> -> vector<16x128xf32>
    %18 = vector.broadcast %16 : vector<1x128xf32> to vector<16x128xf32>
    %19 = arith.addf %17, %18 : vector<16x128xf32>
    %c0_15 = arith.constant 0 : index
    %c0_16 = arith.constant 0 : index
    %20 = vector.load %arg8[%c0_15, %c0_16] : memref<16x128xf32, #tpu.memory_space<vmem>>, vector<16x128xf32>
    tpu.vector_store %arg8[%c0_15, %c0_16], %19 {strides = array<i32>} : memref<16x128xf32, #tpu.memory_space<vmem>>, vector<16x128xf32>,
    return
  }
  func.func @transform_0(%arg0: i32) -> (i32, i32) {
    %c0_i32 = arith.constant 0 : i32
    %c0_i32_0 = arith.constant 0 : i32
    return %arg0, %c0_i32 : i32, i32
  }
  func.func @transform_1(%arg0: i32) -> (i32, i32) {
    %c0_i32 = arith.constant 0 : i32
    %c0_i32_0 = arith.constant 0 : i32
    %c0_i32_1 = arith.constant 0 : i32
    return %c0_i32, %c0_i32_0 : i32, i32
  }
  func.func @transform_2(%arg0: i32) -> (i32, i32) {
    %c0_i32 = arith.constant 0 : i32
    %c0_i32_0 = arith.constant 0 : i32
    %c0_i32_1 = arith.constant 0 : i32
    return %c0_i32, %c0_i32_0 : i32, i32
  }
  func.func @transform_3(%arg0: i32) -> (i32, i32) {
    %c0_i32 = arith.constant 0 : i32
    %c0_i32_0 = arith.constant 0 : i32
    %c0_i32_1 = arith.constant 0 : i32
    return %c0_i32, %c0_i32_0 : i32, i32
  }
  func.func @transform_4(%arg0: i32) -> (i32, i32) {
    %c0_i32 = arith.constant 0 : i32
    %c0_i32_0 = arith.constant 0 : i32
    %c0_i32_1 = arith.constant 0 : i32
    return %c0_i32, %c0_i32_0 : i32, i32
  }
  func.func @transform_5(%arg0: i32) -> (i32, i32) {
    %c0_i32 = arith.constant 0 : i32
    %c0_i32_0 = arith.constant 0 : i32
    %c0_i32_1 = arith.constant 0 : i32
    return %c0_i32, %c0_i32_0 : i32, i32
  }
  func.func @transform_6(%arg0: i32) -> (i32, i32) {
    %c0_i32 = arith.constant 0 : i32
    %c0_i32_0 = arith.constant 0 : i32
    %c0_i32_1 = arith.constant 0 : i32
    return %c0_i32, %c0_i32_0 : i32, i32
  }
  func.func @transform_7(%arg0: i32) -> (i32, i32) {
    %c0_i32 = arith.constant 0 : i32
    %c0_i32_0 = arith.constant 0 : i32
    return %arg0, %c0_i32 : i32, i32
  }
}

</mosaic_0001>

<bundles_post_ra>
// kernel: tpu_custom_call.1
= control target key start
LH: loop header
LB: loop body
LE: loop exit
PB: predicated region body
PF: predicated region fallthrough
CT: control target
= control target key end

     0   :  { %12 = vsyncpa [#allocation3], 0  ;;  %s907_s0 = inlined_call_operand.hbm [shape: bf16[16,128], index: 0, kind: input, shape index: {}]   ;;  %s908_s1 = inlined_call_operand.hbm [shape: bf16[128,128], index: 1, kind: input, shape index: {}]   ;;  %s909_s2 = inlined_call_operand.vmem [shape: f32[1,128], index: 2, kind: input, shape index: {}]   ;;  %s910_s3 = inlined_call_operand.hbm [shape: bf16[128,128], index: 3, kind: input, shape index: {}]   ;;  %s911_s4 = inlined_call_operand.vmem [shape: f32[1,128], index: 4, kind: input, shape index: {}]   ;;  %s912_s5 = inlined_call_operand.hbm [shape: bf16[128,128], index: 5, kind: input, shape index: {}]   ;;  %s913_s6 = inlined_call_operand.vmem [shape: f32[1,128], index: 6, kind: input, shape index: {}]   ;;  %s914_s7 = inlined_call_operand.hbm [shape: f32[16,128], index: 7, kind: output, shape index: {}]  }
   0x1   :  { %13 = vsyncpa [#allocation6], 0 }
   0x2   :  { %14 = vsyncpa [#allocation9], 0 }
   0x3   :  { %15 = vsyncpa [#allocation4], 0  ;;  %s731_s24 = smov [#allocation5]   ;;  %s732_s26 = smov [#allocation2]  }
   0x4   :  { %s33_s25 = sshll.u32 %s731_s24, 4  ;;  %s21_s27 = sshll.u32 %s732_s26, 4  ;;  %s34_s25 = int_to_ptr.vmem [resolvable:$true] %s33_s25  ;;  %s782_s27 = int_to_ptr.vmem [resolvable:$true] %s21_s27 }
   0x5   :  { %s613_s30 = scalar_lea.hbm %s908_s1, 1024 }
   0x6   :  { %p614_p0 = scmp.ne.s32.totalorder %s908_s1, %s613_s30  ;;  %p617_p1 = scmp.lt.u32.totalorder %s613_s30, %s908_s1 }
   0x8   :  { %p619_p2 = pnand %p617_p1, %p614_p0 }
   0xa   :  { %622 = shalt.err (!%p619_p2)
}
   0xb   :  { %s623_s12 = scalar_lea.vmem %s34_s25, 1024  ;;  %p628_p4 = scmp.lt.s32.totalorder %s34_s25, %s34_s25 }
   0xc   :  { %p624_p3 = scmp.ne.s32.totalorder %s34_s25, %s623_s12  ;;  %p629_p5 = scmp.lt.s32.totalorder %s623_s12, %s623_s12 }
   0xe   :  { %p630_p6 = por %p629_p5, %p628_p4 }
  0x10   :  { %p631_p7 = pnand %p630_p6, %p624_p3 }
  0x12   :  { %634 = shalt.err (!%p631_p7)
}
  0x13   :  { %s733_s13 = smov 64   ;;  %s734_s14 = smov 4  }
  0x14   :  { %39 = dma.hbm_to_vmem [thread:$0]  %s908_s1, 1024, %s34_s25, [#allocation6], %s733_s13, %s733_s13, %s734_s14  }
  0x15   :  { %s635_s19 = scalar_lea.hbm %s907_s0, 128 }
  0x16   :  { %p636_p8 = scmp.ne.s32.totalorder %s907_s0, %s635_s19  ;;  %p639_p9 = scmp.lt.u32.totalorder %s635_s19, %s907_s0 }
  0x18   :  { %p641_p10 = pnand %p639_p9, %p636_p8 }
  0x1a   :  { %644 = shalt.err (!%p641_p10)
}
  0x1b   :  { %s645_s24 = scalar_lea.vmem %s782_s27, 128  ;;  %p650_p12 = scmp.lt.s32.totalorder %s782_s27, %s782_s27 }
  0x1c   :  { %p646_p11 = scmp.ne.s32.totalorder %s782_s27, %s645_s24  ;;  %p651_p13 = scmp.lt.s32.totalorder %s645_s24, %s645_s24 }
  0x1e   :  { %p652_p0 = por %p651_p13, %p650_p12 }
  0x20   :  { %p653_p1 = pnand %p652_p0, %p646_p11 }
  0x22   :  { %656 = shalt.err (!%p653_p1)
}
  0x23   :  { %27 = dma.hbm_to_vmem [thread:$0]  %s907_s0, 128, %s782_s27, [#allocation3], %s733_s13, %s733_s13, %s734_s14  }
  0x24   :  { %s735_s26 = smov [#allocation7]   ;;  %s736_s29 = smov [#allocation8]  }
  0x25   :  { %s47_s28 = sshll.u32 %s735_s26, 4  ;;  %s61_s30 = sshll.u32 %s736_s29, 4  ;;  %s48_s28 = int_to_ptr.vmem [resolvable:$true] %s47_s28  ;;  %s819_s30 = int_to_ptr.vmem [resolvable:$true] %s61_s30 }
  0x26   :  { %s657_s10 = scalar_lea.hbm %s910_s3, 1024 }
  0x27   :  { %p658_p2 = scmp.ne.s32.totalorder %s910_s3, %s657_s10  ;;  %p661_p3 = scmp.lt.u32.totalorder %s657_s10, %s910_s3 }
  0x29   :  { %p663_p4 = pnand %p661_p3, %p658_p2 }
  0x2b   :  { %666 = shalt.err (!%p663_p4)
}
  0x2c   :  { %s667_s0 = scalar_lea.vmem %s48_s28, 1024  ;;  %p672_p6 = scmp.lt.s32.totalorder %s48_s28, %s48_s28 }
  0x2d   :  { %p668_p5 = scmp.ne.s32.totalorder %s48_s28, %s667_s0  ;;  %p673_p7 = scmp.lt.s32.totalorder %s667_s0, %s667_s0 }
  0x2f   :  { %p674_p8 = por %p673_p7, %p672_p6 }
  0x31   :  { %p675_p9 = pnand %p674_p8, %p668_p5 }
  0x33   :  { %678 = shalt.err (!%p675_p9)
}
  0x34   :  { %53 = dma.hbm_to_vmem [thread:$0]  %s910_s3, 1024, %s48_s28, [#allocation6], %s733_s13, %s733_s13, %s734_s14  }
  0x35   :  { %s679_s20 = scalar_lea.hbm %s912_s5, 1024 }
  0x36   :  { %p680_p10 = scmp.ne.s32.totalorder %s912_s5, %s679_s20  ;;  %p683_p11 = scmp.lt.u32.totalorder %s679_s20, %s912_s5 }
  0x38   :  { %p685_p12 = pnand %p683_p11, %p680_p10 }
  0x3a   :  { %688 = shalt.err (!%p685_p12)
}
  0x3b   :  { %s689_s1 = scalar_lea.vmem %s819_s30, 1024  ;;  %p694_p0 = scmp.lt.s32.totalorder %s819_s30, %s819_s30 }
  0x3c   :  { %p690_p13 = scmp.ne.s32.totalorder %s819_s30, %s689_s1  ;;  %p695_p1 = scmp.lt.s32.totalorder %s689_s1, %s689_s1 }
  0x3e   :  { %p696_p2 = por %p695_p1, %p694_p0 }
  0x40   :  { %p697_p3 = pnand %p696_p2, %p690_p13 }
  0x42   :  { %700 = shalt.err (!%p697_p3)
}
  0x43   :  { %67 = dma.hbm_to_vmem [thread:$0]  %s912_s5, 1024, %s819_s30, [#allocation9], %s733_s13, %s733_s13, %s734_s14  }
  0x44   :  { %723 = dma.done.wait [#allocation3], 128  }
  0x45   :  { %724 = vsyncadd [#allocation3], 4294967168 }
  0x46   :  { %725 = dma.done.wait [#allocation6], 2048  }
  0x47   :  { %726 = vsyncadd [#allocation6], 4294965248 }
  0x48   :  { %727 = dma.done.wait [#allocation9], 1024  }
  0x49   :  { %728 = vsyncadd [#allocation9], 4294966272  ;;  %v737_v0 = vmov 0.0   ;;  %vm738_vm0 = vmmov 0   ;;  %v580_v1 = vld [vmem:[#allocation5] sm:$0xff]   ;;  %v581_v2 = vld [vmem:[#allocation5 + $0x8] sm:$0xff]  }
  0x4a   :  { %509 = vmatprep.subr.bf16.mxu0 %v737_v0  ;;  %525 = vmatprep.mubr.msk.bf16.mxu0 %vm738_vm0, %v737_v0  ;;  %v582_v3 = vld [vmem:[#allocation5 + $0x10] sm:$0xff]   ;;  %v589_v4 = vld [vmem:[#allocation7] sm:$0xff]   ;;  %v583_v5 = vld [vmem:[#allocation5 + $0x18] sm:$0xff]   ;;  %s739_s29 = smov [#allocation10]  }
  0x4b   :  { %529 = vmatprep.subr.bf16.mxu1 %v737_v0  ;;  %545 = vmatprep.mubr.msk.bf16.mxu1 %vm738_vm0, %v737_v0  ;;  %v590_v6 = vld [vmem:[#allocation7 + $0x8] sm:$0xff]   ;;  %v584_v7 = vld [vmem:[#allocation5 + $0x20] sm:$0xff]   ;;  %v591_v8 = vld [vmem:[#allocation7 + $0x10] sm:$0xff]   ;;  %s440_s30 = sshll.u32 %s739_s29, 4  ;;  %s441_s30 = int_to_ptr.vmem [resolvable:$true] %s440_s30 }
  0x4c   :  { %510 = vmatpush3.bf16.msra.mxu0 %v580_v1  ;;  %530 = vmatpush3.bf16.msra.mxu1 %v589_v4  ;;  %v585_v9 = vld [vmem:[#allocation5 + $0x28] sm:$0xff]   ;;  %v592_v10 = vld [vmem:[#allocation7 + $0x18] sm:$0xff]   ;;  %v586_v11 = vld [vmem:[#allocation5 + $0x30] sm:$0xff]   ;;  %p706_p5 = scmp.lt.s32.totalorder %s441_s30, %s441_s30 }
  0x4d   :  { %511 = vmatprep.subr.bf16.mxu0 %v737_v0  ;;  %531 = vmatprep.subr.bf16.mxu1 %v737_v0  ;;  %v587_v12 = vld [vmem:[#allocation5 + $0x38] sm:$0xff]   ;;  %v593_v14 = vld [vmem:[#allocation7 + $0x20] sm:$0xff]   ;;  %v594_v15 = vld [vmem:[#allocation7 + $0x28] sm:$0xff]  }
  0x4e   :  { %v588_v13 = vld [vmem:[#allocation2] sm:$0xff]   ;;  %v595_v16 = vld [vmem:[#allocation7 + $0x30] sm:$0xff]   ;;  %v597_v18 = vld [vmem:[#allocation8] sm:$0xff]  }
  0x4f   :  { %v596_v17 = vld [vmem:[#allocation7 + $0x38] sm:$0xff]   ;;  %v598_v19 = vld [vmem:[#allocation8 + $0x8] sm:$0xff]   ;;  %v599_v20 = vld [vmem:[#allocation8 + $0x10] sm:$0xff]  }
  0x50   :  { %512 = vmatpush3.bf16.msra.mxu0 %v581_v2  ;;  %532 = vmatpush3.bf16.msra.mxu1 %v590_v6  ;;  %v600_v21 = vld [vmem:[#allocation8 + $0x18] sm:$0xff]   ;;  %v601_v32 = vld [vmem:[#allocation8 + $0x20] sm:$0xff]   ;;  %v602_v33 = vld [vmem:[#allocation8 + $0x28] sm:$0xff]  }
  0x51   :  { %513 = vmatprep.subr.bf16.mxu0 %v737_v0  ;;  %533 = vmatprep.subr.bf16.mxu1 %v737_v0  ;;  %v454_v22 = vld [vmem:[%s909_s2] ss:$0 sm:$0xff]  ;;  %v603_v34 = vld [vmem:[#allocation8 + $0x30] sm:$0xff]  }
  0x52   :  { %v604_v35 = vld [vmem:[#allocation8 + $0x38] sm:$0xff]  }
  0x53   :  { %v464_v36 = vld [vmem:[%s911_s4] ss:$0 sm:$0xff]  ;;  %s701_s4 = scalar_lea.vmem %s441_s30, 256 }
  0x54   :  { %514 = vmatpush3.bf16.msra.mxu0 %v582_v3  ;;  %534 = vmatpush3.bf16.msra.mxu1 %v591_v8  ;;  %v473_v46 = vld [vmem:[%s913_s6] ss:$0 sm:$0xff]  ;;  %p702_p4 = scmp.ne.s32.totalorder %s441_s30, %s701_s4  ;;  %p707_p6 = scmp.lt.s32.totalorder %s701_s4, %s701_s4 }
  0x55   :  { %515 = vmatprep.subr.bf16.mxu0 %v737_v0  ;;  %535 = vmatprep.subr.bf16.mxu1 %v737_v0 }
  0x56   :  { %p708_p7 = por %p707_p6, %p706_p5 }
  0x58   :  { %516 = vmatpush3.bf16.msra.mxu0 %v583_v5  ;;  %536 = vmatpush3.bf16.msra.mxu1 %v592_v10  ;;  %p709_p8 = pnand %p708_p7, %p702_p4 }
  0x59   :  { %517 = vmatprep.subr.bf16.mxu0 %v737_v0  ;;  %537 = vmatprep.subr.bf16.mxu1 %v737_v0 }
  0x5c   :  { %518 = vmatpush3.bf16.msra.mxu0 %v584_v7  ;;  %538 = vmatpush3.bf16.msra.mxu1 %v593_v14 }
  0x5d   :  { %519 = vmatprep.subr.bf16.mxu0 %v737_v0  ;;  %539 = vmatprep.subr.bf16.mxu1 %v737_v0 }
  0x60   :  { %520 = vmatpush3.bf16.msra.mxu0 %v585_v9  ;;  %540 = vmatpush3.bf16.msra.mxu1 %v594_v15 }
  0x61   :  { %521 = vmatprep.subr.bf16.mxu0 %v737_v0  ;;  %541 = vmatprep.subr.bf16.mxu1 %v737_v0 }
  0x64   :  { %522 = vmatpush3.bf16.msra.mxu0 %v586_v11  ;;  %542 = vmatpush3.bf16.msra.mxu1 %v595_v16 }
  0x65   :  { %523 = vmatprep.subr.bf16.mxu0 %v737_v0  ;;  %543 = vmatprep.subr.bf16.mxu1 %v737_v0 }
  0x68   :  { %524 = vmatpush3.bf16.msra.mxu0 %v587_v12  ;;  %544 = vmatpush3.bf16.msra.mxu1 %v596_v17 }
  0x69   :  { %549 = vmatprep.subr.bf16.mxu0 %v737_v0 }
  0x6b   :  { %526 = vmatmul.mubr.bf16.vlgmr.msra.gmra.mrb[0].mxu0 %v588_v13 }
  0x6c   :  { %565 = vmatprep.mubr.msk.bf16.mxu0 %vm738_vm0, %v737_v0  ;;  %550 = vmatpush3.bf16.msra.mxu0 %v597_v18 }
  0x6d   :  { %551 = vmatprep.subr.bf16.mxu0 %v737_v0 }
  0x70   :  { %552 = vmatpush3.bf16.msra.mxu0 %v598_v19 }
  0x71   :  { %553 = vmatprep.subr.bf16.mxu0 %v737_v0 }
  0x74   :  { %554 = vmatpush3.bf16.msra.mxu0 %v599_v20 }
  0x75   :  { %555 = vmatprep.subr.bf16.mxu0 %v737_v0 }
  0x78   :  { %556 = vmatpush3.bf16.msra.mxu0 %v600_v21 }
  0x79   :  { %557 = vmatprep.subr.bf16.mxu0 %v737_v0 }
  0x7c   :  { %558 = vmatpush3.bf16.msra.mxu0 %v601_v32 }
  0x7d   :  { %559 = vmatprep.subr.bf16.mxu0 %v737_v0 }
  0x80   :  { %560 = vmatpush3.bf16.msra.mxu0 %v602_v33 }
  0x81   :  { %561 = vmatprep.subr.bf16.mxu0 %v737_v0 }
  0x84   :  { %562 = vmatpush3.bf16.msra.mxu0 %v603_v34 }
  0x85   :  { %563 = vmatprep.subr.bf16.mxu0 %v737_v0 }
  0x88   :  { %564 = vmatpush3.bf16.msra.mxu0 %v604_v35 }
 0x13e   :  { %v196_v23 = vpop.f32.mrb[0].mxu0 }
 0x13f   :  { %v197_v24 = vadd.f32 %v454_v22, %v196_v23  ;;  %v527_v25 = vpop.f32.mrb[1].mxu0 }
 0x140   :  { %v199_v26 = vpop.f32.mrb[2].mxu0 }
 0x141   :  { %v200_v27 = vadd.f32 %v454_v22, %v199_v26  ;;  %v528_v28 = vpop.f32.mrb[3].mxu0  ;;  %605 = vtanh.f32 %v197_v24 }
 0x143   :  { %607 = vtanh.f32 %v200_v27 }
 0x14b   :  { %v606_v29 = vpop.eup %605 }
 0x14d   :  { %v608_v30 = vpop.eup %607 }
 0x14e   :  { %v205_v31 = vpack.c.bf16 %v608_v30, %v606_v29 }
 0x150   :  { %546 = vmatmul.mubr.bf16.vlgmr.msra.gmra.mrb[0].mxu1 %v205_v31 }
 0x223   :  { %v311_v37 = vpop.f32.mrb[0].mxu1 }
 0x224   :  { %v312_v38 = vadd.f32 %v464_v36, %v311_v37  ;;  %v547_v39 = vpop.f32.mrb[1].mxu1 }
 0x225   :  { %v314_v40 = vpop.f32.mrb[2].mxu1 }
 0x226   :  { %v315_v41 = vadd.f32 %v464_v36, %v314_v40  ;;  %v548_v42 = vpop.f32.mrb[3].mxu1  ;;  %609 = vtanh.f32 %v312_v38 }
 0x228   :  { %611 = vtanh.f32 %v315_v41 }
 0x230   :  { %v610_v43 = vpop.eup %609 }
 0x232   :  { %v612_v44 = vpop.eup %611 }
 0x233   :  { %v320_v45 = vpack.c.bf16 %v612_v44, %v610_v43 }
 0x235   :  { %566 = vmatmul.mubr.bf16.vlgmr.msra.gmra.mrb[4].mxu0 %v320_v45 }
 0x308   :  { %v426_v47 = vpop.f32.mrb[4].mxu0 }
 0x309   :  { %v427_v48 = vadd.f32 %v473_v46, %v426_v47  ;;  %v567_v49 = vpop.f32.mrb[5].mxu0 }
 0x30a   :  { %v429_v50 = vpop.f32.mrb[6].mxu0 }
 0x30b   :  { %433 = vst [vmem:[#allocation10] sm:$0xff] %v427_v48  ;;  %v430_v51 = vadd.f32 %v473_v46, %v429_v50  ;;  %v568_v52 = vpop.f32.mrb[7].mxu0 }
 0x30d   :  { %434 = vst [vmem:[#allocation10 + $0x8] sm:$0xff] %v430_v51 }
 0x30e   :  { %712 = shalt.err (!%p709_p8)
}
 0x30f   :  { %s713_s9 = scalar_lea.hbm %s914_s7, 256 }
 0x310   :  { %p714_p9 = scmp.ne.s32.totalorder %s914_s7, %s713_s9  ;;  %p717_p10 = scmp.lt.u32.totalorder %s713_s9, %s914_s7 }
 0x312   :  { %p719_p11 = pnand %p717_p10, %p714_p9 }
 0x314   :  { %722 = shalt.err (!%p719_p11)
}
 0x315   :  { %s740_s16 = smov 128   ;;  %s741_s0 = smov 8  }
 0x316   :  { %446 = dma.vmem_to_hbm [thread:$0]  %s441_s30, 256, %s914_s7, [#allocation4], %s740_s16, %s740_s16, %s741_s0  }
 0x317   :  { %729 = dma.done.wait [#allocation4], 256  }
 0x318   :  { %730 = vsyncadd [#allocation4], 4294967040 }
 0x319   :  { %450 = vsyncpa [#allocation3], 1 }
 0x31a   :  { %451 = vsyncpa [#allocation6], 1 }
 0x31b   :  { %452 = vsyncpa [#allocation9], 1 }
 0x31c   :  { %453 = vsyncpa [#allocation4], 1 }

// kernel: tpu_custom_call.1
= control target key start
LH: loop header
LB: loop body
LE: loop exit
PB: predicated region body
PF: predicated region fallthrough
CT: control target
= control target key end

     0   :  { %12 = vsyncpa [#allocation3], 0  ;;  %s907_s0 = inlined_call_operand.hbm [shape: bf16[16,128], index: 0, kind: input, shape index: {}]   ;;  %s908_s1 = inlined_call_operand.hbm [shape: bf16[128,128], index: 1, kind: input, shape index: {}]   ;;  %s909_s2 = inlined_call_operand.vmem [shape: f32[1,128], index: 2, kind: input, shape index: {}]   ;;  %s910_s3 = inlined_call_operand.hbm [shape: bf16[128,128], index: 3, kind: input, shape index: {}]   ;;  %s911_s4 = inlined_call_operand.vmem [shape: f32[1,128], index: 4, kind: input, shape index: {}]   ;;  %s912_s5 = inlined_call_operand.hbm [shape: bf16[128,128], index: 5, kind: input, shape index: {}]   ;;  %s913_s6 = inlined_call_operand.vmem [shape: f32[1,128], index: 6, kind: input, shape index: {}]   ;;  %s914_s7 = inlined_call_operand.hbm [shape: f32[16,128], index: 7, kind: output, shape index: {}]  }
   0x1   :  { %13 = vsyncpa [#allocation6], 0 }
   0x2   :  { %14 = vsyncpa [#allocation9], 0 }
   0x3   :  { %15 = vsyncpa [#allocation4], 0  ;;  %s731_s24 = smov [#allocation5]   ;;  %s732_s26 = smov [#allocation2]  }
   0x4   :  { %s33_s25 = sshll.u32 %s731_s24, 4  ;;  %s21_s27 = sshll.u32 %s732_s26, 4  ;;  %s34_s25 = int_to_ptr.vmem [resolvable:$true] %s33_s25  ;;  %s782_s27 = int_to_ptr.vmem [resolvable:$true] %s21_s27 }
   0x5   :  { %s613_s30 = scalar_lea.hbm %s908_s1, 1024 }
   0x6   :  { %p614_p0 = scmp.ne.s32.totalorder %s908_s1, %s613_s30  ;;  %p617_p1 = scmp.lt.u32.totalorder %s613_s30, %s908_s1 }
   0x8   :  { %p619_p2 = pnand %p617_p1, %p614_p0 }
   0xa   :  { %622 = shalt.err (!%p619_p2)
}
   0xb   :  { %s623_s12 = scalar_lea.vmem %s34_s25, 1024  ;;  %p628_p4 = scmp.lt.s32.totalorder %s34_s25, %s34_s25 }
   0xc   :  { %p624_p3 = scmp.ne.s32.totalorder %s34_s25, %s623_s12  ;;  %p629_p5 = scmp.lt.s32.totalorder %s623_s12, %s623_s12 }
   0xe   :  { %p630_p6 = por %p629_p5, %p628_p4 }
  0x10   :  { %p631_p7 = pnand %p630_p6, %p624_p3 }
  0x12   :  { %634 = shalt.err (!%p631_p7)
}
  0x13   :  { %s733_s13 = smov 64   ;;  %s734_s14 = smov 4  }
  0x14   :  { %39 = dma.hbm_to_vmem [thread:$0]  %s908_s1, 1024, %s34_s25, [#allocation6], %s733_s13, %s733_s13, %s734_s14  }
  0x15   :  { %s635_s19 = scalar_lea.hbm %s907_s0, 128 }
  0x16   :  { %p636_p8 = scmp.ne.s32.totalorder %s907_s0, %s635_s19  ;;  %p639_p9 = scmp.lt.u32.totalorder %s635_s19, %s907_s0 }
  0x18   :  { %p641_p10 = pnand %p639_p9, %p636_p8 }
  0x1a   :  { %644 = shalt.err (!%p641_p10)
}
  0x1b   :  { %s645_s24 = scalar_lea.vmem %s782_s27, 128  ;;  %p650_p12 = scmp.lt.s32.totalorder %s782_s27, %s782_s27 }
  0x1c   :  { %p646_p11 = scmp.ne.s32.totalorder %s782_s27, %s645_s24  ;;  %p651_p13 = scmp.lt.s32.totalorder %s645_s24, %s645_s24 }
  0x1e   :  { %p652_p0 = por %p651_p13, %p650_p12 }
  0x20   :  { %p653_p1 = pnand %p652_p0, %p646_p11 }
  0x22   :  { %656 = shalt.err (!%p653_p1)
}
  0x23   :  { %27 = dma.hbm_to_vmem [thread:$0]  %s907_s0, 128, %s782_s27, [#allocation3], %s733_s13, %s733_s13, %s734_s14  }
  0x24   :  { %s735_s26 = smov [#allocation7]   ;;  %s736_s29 = smov [#allocation8]  }
  0x25   :  { %s47_s28 = sshll.u32 %s735_s26, 4  ;;  %s61_s30 = sshll.u32 %s736_s29, 4  ;;  %s48_s28 = int_to_ptr.vmem [resolvable:$true] %s47_s28  ;;  %s819_s30 = int_to_ptr.vmem [resolvable:$true] %s61_s30 }
  0x26   :  { %s657_s10 = scalar_lea.hbm %s910_s3, 1024 }
  0x27   :  { %p658_p2 = scmp.ne.s32.totalorder %s910_s3, %s657_s10  ;;  %p661_p3 = scmp.lt.u32.totalorder %s657_s10, %s910_s3 }
  0x29   :  { %p663_p4 = pnand %p661_p3, %p658_p2 }
  0x2b   :  { %666 = shalt.err (!%p663_p4)
}
  0x2c   :  { %s667_s0 = scalar_lea.vmem %s48_s28, 1024  ;;  %p672_p6 = scmp.lt.s32.totalorder %s48_s28, %s48_s28 }
  0x2d   :  { %p668_p5 = scmp.ne.s32.totalorder %s48_s28, %s667_s0  ;;  %p673_p7 = scmp.lt.s32.totalorder %s667_s0, %s667_s0 }
  0x2f   :  { %p674_p8 = por %p673_p7, %p672_p6 }
  0x31   :  { %p675_p9 = pnand %p674_p8, %p668_p5 }
  0x33   :  { %678 = shalt.err (!%p675_p9)
}
  0x34   :  { %53 = dma.hbm_to_vmem [thread:$0]  %s910_s3, 1024, %s48_s28, [#allocation6], %s733_s13, %s733_s13, %s734_s14  }
  0x35   :  { %s679_s20 = scalar_lea.hbm %s912_s5, 1024 }
  0x36   :  { %p680_p10 = scmp.ne.s32.totalorder %s912_s5, %s679_s20  ;;  %p683_p11 = scmp.lt.u32.totalorder %s679_s20, %s912_s5 }
  0x38   :  { %p685_p12 = pnand %p683_p11, %p680_p10 }
  0x3a   :  { %688 = shalt.err (!%p685_p12)
}
  0x3b   :  { %s689_s1 = scalar_lea.vmem %s819_s30, 1024  ;;  %p694_p0 = scmp.lt.s32.totalorder %s819_s30, %s819_s30 }
  0x3c   :  { %p690_p13 = scmp.ne.s32.totalorder %s819_s30, %s689_s1  ;;  %p695_p1 = scmp.lt.s32.totalorder %s689_s1, %s689_s1 }
  0x3e   :  { %p696_p2 = por %p695_p1, %p694_p0 }
  0x40   :  { %p697_p3 = pnand %p696_p2, %p690_p13 }
  0x42   :  { %700 = shalt.err (!%p697_p3)
}
  0x43   :  { %67 = dma.hbm_to_vmem [thread:$0]  %s912_s5, 1024, %s819_s30, [#allocation9], %s733_s13, %s733_s13, %s734_s14  }
  0x44   :  { %723 = dma.done.wait [#allocation3], 128  }
  0x45   :  { %724 = vsyncadd [#allocation3], 4294967168 }
  0x46   :  { %725 = dma.done.wait [#allocation6], 2048  }
  0x47   :  { %726 = vsyncadd [#allocation6], 4294965248 }
  0x48   :  { %727 = dma.done.wait [#allocation9], 1024  }
  0x49   :  { %728 = vsyncadd [#allocation9], 4294966272  ;;  %v737_v0 = vmov 0.0   ;;  %vm738_vm0 = vmmov 0   ;;  %v580_v1 = vld [vmem:[#allocation5] sm:$0xff]   ;;  %v581_v2 = vld [vmem:[#allocation5 + $0x8] sm:$0xff]  }
  0x4a   :  { %509 = vmatprep.subr.bf16.mxu0 %v737_v0  ;;  %525 = vmatprep.mubr.msk.bf16.mxu0 %vm738_vm0, %v737_v0  ;;  %v582_v3 = vld [vmem:[#allocation5 + $0x10] sm:$0xff]   ;;  %v589_v4 = vld [vmem:[#allocation7] sm:$0xff]   ;;  %v583_v5 = vld [vmem:[#allocation5 + $0x18] sm:$0xff]   ;;  %s739_s29 = smov [#allocation10]  }
  0x4b   :  { %529 = vmatprep.subr.bf16.mxu1 %v737_v0  ;;  %545 = vmatprep.mubr.msk.bf16.mxu1 %vm738_vm0, %v737_v0  ;;  %v590_v6 = vld [vmem:[#allocation7 + $0x8] sm:$0xff]   ;;  %v584_v7 = vld [vmem:[#allocation5 + $0x20] sm:$0xff]   ;;  %v591_v8 = vld [vmem:[#allocation7 + $0x10] sm:$0xff]   ;;  %s440_s30 = sshll.u32 %s739_s29, 4  ;;  %s441_s30 = int_to_ptr.vmem [resolvable:$true] %s440_s30 }
  0x4c   :  { %510 = vmatpush3.bf16.msra.mxu0 %v580_v1  ;;  %530 = vmatpush3.bf16.msra.mxu1 %v589_v4  ;;  %v585_v9 = vld [vmem:[#allocation5 + $0x28] sm:$0xff]   ;;  %v592_v10 = vld [vmem:[#allocation7 + $0x18] sm:$0xff]   ;;  %v586_v11 = vld [vmem:[#allocation5 + $0x30] sm:$0xff]   ;;  %p706_p5 = scmp.lt.s32.totalorder %s441_s30, %s441_s30 }
  0x4d   :  { %511 = vmatprep.subr.bf16.mxu0 %v737_v0  ;;  %531 = vmatprep.subr.bf16.mxu1 %v737_v0  ;;  %v587_v12 = vld [vmem:[#allocation5 + $0x38] sm:$0xff]   ;;  %v593_v14 = vld [vmem:[#allocation7 + $0x20] sm:$0xff]   ;;  %v594_v15 = vld [vmem:[#allocation7 + $0x28] sm:$0xff]  }
  0x4e   :  { %v588_v13 = vld [vmem:[#allocation2] sm:$0xff]   ;;  %v595_v16 = vld [vmem:[#allocation7 + $0x30] sm:$0xff]   ;;  %v597_v18 = vld [vmem:[#allocation8] sm:$0xff]  }
  0x4f   :  { %v596_v17 = vld [vmem:[#allocation7 + $0x38] sm:$0xff]   ;;  %v598_v19 = vld [vmem:[#allocation8 + $0x8] sm:$0xff]   ;;  %v599_v20 = vld [vmem:[#allocation8 + $0x10] sm:$0xff]  }
  0x50   :  { %512 = vmatpush3.bf16.msra.mxu0 %v581_v2  ;;  %532 = vmatpush3.bf16.msra.mxu1 %v590_v6  ;;  %v600_v21 = vld [vmem:[#allocation8 + $0x18] sm:$0xff]   ;;  %v601_v32 = vld [vmem:[#allocation8 + $0x20] sm:$0xff]   ;;  %v602_v33 = vld [vmem:[#allocation8 + $0x28] sm:$0xff]  }
  0x51   :  { %513 = vmatprep.subr.bf16.mxu0 %v737_v0  ;;  %533 = vmatprep.subr.bf16.mxu1 %v737_v0  ;;  %v454_v22 = vld [vmem:[%s909_s2] ss:$0 sm:$0xff]  ;;  %v603_v34 = vld [vmem:[#allocation8 + $0x30] sm:$0xff]  }
  0x52   :  { %v604_v35 = vld [vmem:[#allocation8 + $0x38] sm:$0xff]  }
  0x53   :  { %v464_v36 = vld [vmem:[%s911_s4] ss:$0 sm:$0xff]  ;;  %s701_s4 = scalar_lea.vmem %s441_s30, 256 }
  0x54   :  { %514 = vmatpush3.bf16.msra.mxu0 %v582_v3  ;;  %534 = vmatpush3.bf16.msra.mxu1 %v591_v8  ;;  %v473_v46 = vld [vmem:[%s913_s6] ss:$0 sm:$0xff]  ;;  %p702_p4 = scmp.ne.s32.totalorder %s441_s30, %s701_s4  ;;  %p707_p6 = scmp.lt.s32.totalorder %s701_s4, %s701_s4 }
  0x55   :  { %515 = vmatprep.subr.bf16.mxu0 %v737_v0  ;;  %535 = vmatprep.subr.bf16.mxu1 %v737_v0 }
  0x56   :  { %p708_p7 = por %p707_p6, %p706_p5 }
  0x58   :  { %516 = vmatpush3.bf16.msra.mxu0 %v583_v5  ;;  %536 = vmatpush3.bf16.msra.mxu1 %v592_v10  ;;  %p709_p8 = pnand %p708_p7, %p702_p4 }
  0x59   :  { %517 = vmatprep.subr.bf16.mxu0 %v737_v0  ;;  %537 = vmatprep.subr.bf16.mxu1 %v737_v0 }
  0x5c   :  { %518 = vmatpush3.bf16.msra.mxu0 %v584_v7  ;;  %538 = vmatpush3.bf16.msra.mxu1 %v593_v14 }
  0x5d   :  { %519 = vmatprep.subr.bf16.mxu0 %v737_v0  ;;  %539 = vmatprep.subr.bf16.mxu1 %v737_v0 }
  0x60   :  { %520 = vmatpush3.bf16.msra.mxu0 %v585_v9  ;;  %540 = vmatpush3.bf16.msra.mxu1 %v594_v15 }
  0x61   :  { %521 = vmatprep.subr.bf16.mxu0 %v737_v0  ;;  %541 = vmatprep.subr.bf16.mxu1 %v737_v0 }
  0x64   :  { %522 = vmatpush3.bf16.msra.mxu0 %v586_v11  ;;  %542 = vmatpush3.bf16.msra.mxu1 %v595_v16 }
  0x65   :  { %523 = vmatprep.subr.bf16.mxu0 %v737_v0  ;;  %543 = vmatprep.subr.bf16.mxu1 %v737_v0 }
  0x68   :  { %524 = vmatpush3.bf16.msra.mxu0 %v587_v12  ;;  %544 = vmatpush3.bf16.msra.mxu1 %v596_v17 }
  0x69   :  { %549 = vmatprep.subr.bf16.mxu0 %v737_v0 }
  0x6b   :  { %526 = vmatmul.mubr.bf16.vlgmr.msra.gmra.mrb[0].mxu0 %v588_v13 }
  0x6c   :  { %565 = vmatprep.mubr.msk.bf16.mxu0 %vm738_vm0, %v737_v0  ;;  %550 = vmatpush3.bf16.msra.mxu0 %v597_v18 }
  0x6d   :  { %551 = vmatprep.subr.bf16.mxu0 %v737_v0 }
  0x70   :  { %552 = vmatpush3.bf16.msra.mxu0 %v598_v19 }
  0x71   :  { %553 = vmatprep.subr.bf16.mxu0 %v737_v0 }
  0x74   :  { %554 = vmatpush3.bf16.msra.mxu0 %v599_v20 }
  0x75   :  { %555 = vmatprep.subr.bf16.mxu0 %v737_v0 }
  0x78   :  { %556 = vmatpush3.bf16.msra.mxu0 %v600_v21 }
  0x79   :  { %557 = vmatprep.subr.bf16.mxu0 %v737_v0 }
  0x7c   :  { %558 = vmatpush3.bf16.msra.mxu0 %v601_v32 }
  0x7d   :  { %559 = vmatprep.subr.bf16.mxu0 %v737_v0 }
  0x80   :  { %560 = vmatpush3.bf16.msra.mxu0 %v602_v33 }
  0x81   :  { %561 = vmatprep.subr.bf16.mxu0 %v737_v0 }
  0x84   :  { %562 = vmatpush3.bf16.msra.mxu0 %v603_v34 }
  0x85   :  { %563 = vmatprep.subr.bf16.mxu0 %v737_v0 }
  0x88   :  { %564 = vmatpush3.bf16.msra.mxu0 %v604_v35 }
 0x13e   :  { %v196_v23 = vpop.f32.mrb[0].mxu0 }
 0x13f   :  { %v197_v24 = vadd.f32 %v454_v22, %v196_v23  ;;  %v527_v25 = vpop.f32.mrb[1].mxu0 }
 0x140   :  { %v199_v26 = vpop.f32.mrb[2].mxu0 }
 0x141   :  { %v200_v27 = vadd.f32 %v454_v22, %v199_v26  ;;  %v528_v28 = vpop.f32.mrb[3].mxu0  ;;  %605 = vtanh.f32 %v197_v24 }
 0x143   :  { %607 = vtanh.f32 %v200_v27 }
 0x14b   :  { %v606_v29 = vpop.eup %605 }
 0x14d   :  { %v608_v30 = vpop.eup %607 }
 0x14e   :  { %v205_v31 = vpack.c.bf16 %v608_v30, %v606_v29 }
 0x150   :  { %546 = vmatmul.mubr.bf16.vlgmr.msra.gmra.mrb[0].mxu1 %v205_v31 }
 0x223   :  { %v311_v37 = vpop.f32.mrb[0].mxu1 }
 0x224   :  { %v312_v38 = vadd.f32 %v464_v36, %v311_v37  ;;  %v547_v39 = vpop.f32.mrb[1].mxu1 }
 0x225   :  { %v314_v40 = vpop.f32.mrb[2].mxu1 }
 0x226   :  { %v315_v41 = vadd.f32 %v464_v36, %v314_v40  ;;  %v548_v42 = vpop.f32.mrb[3].mxu1  ;;  %609 = vtanh.f32 %v312_v38 }
 0x228   :  { %611 = vtanh.f32 %v315_v41 }
 0x230   :  { %v610_v43 = vpop.eup %609 }
 0x232   :  { %v612_v44 = vpop.eup %611 }
 0x233   :  { %v320_v45 = vpack.c.bf16 %v612_v44, %v610_v43 }
 0x235   :  { %566 = vmatmul.mubr.bf16.vlgmr.msra.gmra.mrb[4].mxu0 %v320_v45 }
 0x308   :  { %v426_v47 = vpop.f32.mrb[4].mxu0 }
 0x309   :  { %v427_v48 = vadd.f32 %v473_v46, %v426_v47  ;;  %v567_v49 = vpop.f32.mrb[5].mxu0 }
 0x30a   :  { %v429_v50 = vpop.f32.mrb[6].mxu0 }
 0x30b   :  { %433 = vst [vmem:[#allocation10] sm:$0xff] %v427_v48  ;;  %v430_v51 = vadd.f32 %v473_v46, %v429_v50  ;;  %v568_v52 = vpop.f32.mrb[7].mxu0 }
 0x30d   :  { %434 = vst [vmem:[#allocation10 + $0x8] sm:$0xff] %v430_v51 }
 0x30e   :  { %712 = shalt.err (!%p709_p8)
}
 0x30f   :  { %s713_s9 = scalar_lea.hbm %s914_s7, 256 }
 0x310   :  { %p714_p9 = scmp.ne.s32.totalorder %s914_s7, %s713_s9  ;;  %p717_p10 = scmp.lt.u32.totalorder %s713_s9, %s914_s7 }
 0x312   :  { %p719_p11 = pnand %p717_p10, %p714_p9 }
 0x314   :  { %722 = shalt.err (!%p719_p11)
}
 0x315   :  { %s740_s16 = smov 128   ;;  %s741_s0 = smov 8  }
 0x316   :  { %446 = dma.vmem_to_hbm [thread:$0]  %s441_s30, 256, %s914_s7, [#allocation4], %s740_s16, %s740_s16, %s741_s0  }
 0x317   :  { %729 = dma.done.wait [#allocation4], 256  }
 0x318   :  { %730 = vsyncadd [#allocation4], 4294967040 }
 0x319   :  { %450 = vsyncpa [#allocation3], 1 }
 0x31a   :  { %451 = vsyncpa [#allocation6], 1 }
 0x31b   :  { %452 = vsyncpa [#allocation9], 1 }
 0x31c   :  { %453 = vsyncpa [#allocation4], 1 }

</bundles_post_ra>
